<compile_context>
chip_gen: v7x
topology: tpu7x:2x2x1
jax: 0.10.0
libtpu: 0.0.40
codegen_flags: <defaults>
</compile_context>

<pallas_src>
import functools

import jax
import jax.numpy as jnp
from jax.experimental import pallas as pl
from jax.experimental.pallas import tpu as pltpu

_LANES = 128
_MAX_TILE_ROWS = 1024  # (1024,128) f32 = 512 KiB per buffer; 2 in x 2 bufs = 2 MiB


def _mse_kernel(x_ref, t_ref, loss_ref, acc_ref, *, inv_n):
    i = pl.program_id(0)

    @pl.when(i == 0)
    def _():
        acc_ref[...] = jnp.zeros_like(acc_ref)

    # Cast per tile inside the kernel (inputs stream in native dtype).
    d = x_ref[...].astype(jnp.float32) - t_ref[...].astype(jnp.float32)
    acc_ref[...] += d * d  # pure VPU work, hides under the input DMA

    @pl.when(i == pl.num_programs(0) - 1)
    def _():
        # Single cross-lane reduce + scalar write in the epilogue only.
        loss_ref[0] = jnp.sum(acc_ref[...]) * jnp.float32(inv_n)


def _round_up(v, m):
    return ((v + m - 1) // m) * m


def content_loss_forward(x, target):
    """Returns (input_passthrough, mse_loss_scalar) — mirrors ContentLoss."""
    assert x.shape == target.shape, "input/target shape mismatch"
    n_total = x.size

    # Flatten to a lane-dense (rows, 128) slab; zero-pad the tail so rows is
    # a multiple of the tile height (zero diff -> zero contribution to sum).
    rows = pl.cdiv(n_total, _LANES)
    if rows <= _MAX_TILE_ROWS:
        tile_r = max(8, _round_up(rows, 8))
    else:
        tile_r = _MAX_TILE_ROWS
    padded_rows = _round_up(rows, tile_r)
    padded_total = padded_rows * _LANES

    xf = x.reshape(-1)
    tf = target.reshape(-1)
    pad = padded_total - n_total
    if pad:
        xf = jnp.pad(xf, (0, pad))
        tf = jnp.pad(tf, (0, pad))
    xf = xf.reshape(padded_rows, _LANES)
    tf = tf.reshape(padded_rows, _LANES)

    loss = pl.pallas_call(
        functools.partial(_mse_kernel, inv_n=1.0 / float(n_total)),
        out_shape=jax.ShapeDtypeStruct((1,), jnp.float32),
        grid=(padded_rows // tile_r,),
        in_specs=[
            pl.BlockSpec((tile_r, _LANES), lambda i: (i, 0)),
            pl.BlockSpec((tile_r, _LANES), lambda i: (i, 0)),
        ],
        out_specs=pl.BlockSpec(memory_space=pltpu.SMEM),
        scratch_shapes=[pltpu.VMEM((tile_r, _LANES), jnp.float32)],
        compiler_params=pltpu.CompilerParams(
            dimension_semantics=("arbitrary",),  # sequential accumulation
        ),
    )(xf, tf)

    # Module returns `input` unchanged; loss is the side-effect value.
    return x, loss[0]


if __name__ == "__main__":
    key = jax.random.PRNGKey(0)
    k_in, k_tg = jax.random.split(key)

    # Small NCHW feature map: batch=2, C=4, 16x16.
    shape = (2, 4, 16, 16)
    x = jax.random.normal(k_in, shape, dtype=jnp.float32)
    # "target" plays the role of the detached target feature map from __init__.
    target = jax.random.normal(k_tg, shape, dtype=jnp.float32)

    out, loss = content_loss_forward(x, target)
    jax.block_until_ready((out, loss))

    # Reference check (pure JAX): F.mse_loss default reduction='mean'.
    ref_loss = jnp.mean((x - target) ** 2)
    assert jnp.allclose(loss, ref_loss, rtol=1e-6, atol=1e-6), (loss, ref_loss)
    assert jnp.array_equal(out, x)  # forward returns input unchanged

    print("KERNEL_OK")
</pallas_src>

<mosaic_0001>
module attributes {stable_mosaic.version = 11 : i64} {
  func.func @_mse_kernel(%arg0: i32, %arg1: memref<16x128xf32, #tpu.memory_space<vmem>>, %arg2: memref<16x128xf32, #tpu.memory_space<vmem>>, %arg3: memref<1xf32, #tpu.memory_space<smem>>, %arg4: memref<16x128xf32, #tpu.memory_space<vmem>>) attributes {dimension_semantics = [#tpu.dimension_semantics<arbitrary>], iteration_bounds = array<i64: 1>, scalar_prefetch = 0 : i64, scratch_operands = 1 : i64, tpu.core_type = #tpu.core_type<tc>, window_params = [{transform_indices = @transform_0, window_bounds = array<i64: 16, 128>}, {transform_indices = @transform_1, window_bounds = array<i64: 16, 128>}, {transform_indices = @transform_2, window_bounds = array<i64: 1>}]} {
    %c0_i32 = arith.constant 0 : i32
    %0 = arith.cmpi eq, %arg0, %c0_i32 : i32
    %1 = arith.extui %0 : i1 to i32
    %c0_i32_0 = arith.constant 0 : i32
    %2 = arith.cmpi ne, %1, %c0_i32_0 : i32
    scf.if %2 {
      %cst = arith.constant 0.000000e+00 : f32
      %13 = vector.broadcast %cst : f32 to vector<16x128xf32>
      %c0_10 = arith.constant 0 : index
      %c0_11 = arith.constant 0 : index
      %14 = vector.load %arg4[%c0_10, %c0_11] : memref<16x128xf32, #tpu.memory_space<vmem>>, vector<16x128xf32>
      tpu.vector_store %arg4[%c0_10, %c0_11], %13 {strides = array<i32>} : memref<16x128xf32, #tpu.memory_space<vmem>>, vector<16x128xf32>,
    } else {
    }
    %c0 = arith.constant 0 : index
    %c0_1 = arith.constant 0 : index
    %3 = vector.load %arg1[%c0, %c0_1] : memref<16x128xf32, #tpu.memory_space<vmem>>, vector<16x128xf32>
    %c0_2 = arith.constant 0 : index
    %c0_3 = arith.constant 0 : index
    %4 = vector.load %arg2[%c0_2, %c0_3] : memref<16x128xf32, #tpu.memory_space<vmem>>, vector<16x128xf32>
    %5 = arith.subf %3, %4 : vector<16x128xf32>
    %c0_4 = arith.constant 0 : index
    %c0_5 = arith.constant 0 : index
    %6 = vector.load %arg4[%c0_4, %c0_5] : memref<16x128xf32, #tpu.memory_space<vmem>>, vector<16x128xf32>
    %7 = arith.mulf %5, %5 : vector<16x128xf32>
    %8 = arith.addf %6, %7 : vector<16x128xf32>
    %c0_6 = arith.constant 0 : index
    %c0_7 = arith.constant 0 : index
    %9 = vector.load %arg4[%c0_6, %c0_7] : memref<16x128xf32, #tpu.memory_space<vmem>>, vector<16x128xf32>
    tpu.vector_store %arg4[%c0_6, %c0_7], %8 {strides = array<i32>} : memref<16x128xf32, #tpu.memory_space<vmem>>, vector<16x128xf32>,
    %c0_i32_8 = arith.constant 0 : i32
    %10 = arith.cmpi eq, %arg0, %c0_i32_8 : i32
    %11 = arith.extui %10 : i1 to i32
    %c0_i32_9 = arith.constant 0 : i32
    %12 = arith.cmpi ne, %11, %c0_i32_9 : i32
    scf.if %12 {
      %c0_10 = arith.constant 0 : index
      %c0_11 = arith.constant 0 : index
      %13 = vector.load %arg4[%c0_10, %c0_11] : memref<16x128xf32, #tpu.memory_space<vmem>>, vector<16x128xf32>
      %14 = vector.shape_cast %13 : vector<16x128xf32> to vector<1x16x128xf32>
      %cst = arith.constant dense<0.000000e+00> : vector<1xf32>
      %15 = vector.multi_reduction <add>, %14, %cst [1, 2] : vector<1x16x128xf32> to vector<1xf32>
      %16 = vector.shape_cast %15 : vector<1xf32> to vector<1x1x1xf32>
      %17 = vector.extract %16[0, 0, 0] : f32 from vector<1x1x1xf32>
      %cst_12 = arith.constant 4.8828125E-4 : f32
      %18 = arith.mulf %17, %cst_12 : f32
      %c0_13 = arith.constant 0 : index
      %19 = memref.load %arg3[%c0_13] : memref<1xf32, #tpu.memory_space<smem>>
      memref.store %18, %arg3[%c0_13] : memref<1xf32, #tpu.memory_space<smem>>
    } else {
    }
    return
  }
  func.func @transform_0(%arg0: i32) -> (i32, i32) {
    %c0_i32 = arith.constant 0 : i32
    %c0_i32_0 = arith.constant 0 : i32
    return %arg0, %c0_i32 : i32, i32
  }
  func.func @transform_1(%arg0: i32) -> (i32, i32) {
    %c0_i32 = arith.constant 0 : i32
    %c0_i32_0 = arith.constant 0 : i32
    return %arg0, %c0_i32 : i32, i32
  }
  func.func @transform_2(%arg0: i32) -> i32 {
    %c0_i32 = arith.constant 0 : i32
    %c0_i32_0 = arith.constant 0 : i32
    return %c0_i32 : i32
  }
}

</mosaic_0001>

<bundles_post_ra>
// kernel: tpu_custom_call.1
= control target key start
LH: loop header
LB: loop body
LE: loop exit
PB: predicated region body
PF: predicated region fallthrough
CT: control target
= control target key end

     0   :  { %7 = vsyncpa [#allocation4], 0  ;;  %s216_s0 = inlined_call_operand.hbm [shape: f32[16,128], index: 0, kind: input, shape index: {}]   ;;  %s217_s1 = inlined_call_operand.hbm [shape: f32[16,128], index: 1, kind: input, shape index: {}]   ;;  %s218_s2 = inlined_call_operand.hbm [shape: f32[1], index: 2, kind: output, shape index: {}]  }
   0x1   :  { %8 = vsyncpa [#allocation7], 0 }
   0x2   :  { %9 = vsyncpa [#allocation5], 0  ;;  %s160_s9 = smov [#allocation3]   ;;  %s100_s13 = scalar_lea.hbm %s216_s0, 256 }
   0x3   :  { %s15_s10 = sshll.u32 %s160_s9, 4  ;;  %p101_p0 = scmp.ne.s32.totalorder %s216_s0, %s100_s13  ;;  %s16_s10 = int_to_ptr.vmem [resolvable:$true] %s15_s10 }
   0x4   :  { %p104_p1 = scmp.lt.u32.totalorder %s100_s13, %s216_s0 }
   0x6   :  { %p106_p2 = pnand %p104_p1, %p101_p0 }
   0x8   :  { %109 = shalt.err (!%p106_p2)
}
   0x9   :  { %s110_s18 = scalar_lea.vmem %s16_s10, 256  ;;  %p115_p4 = scmp.lt.s32.totalorder %s16_s10, %s16_s10 }
   0xa   :  { %p111_p3 = scmp.ne.s32.totalorder %s16_s10, %s110_s18  ;;  %p116_p5 = scmp.lt.s32.totalorder %s110_s18, %s110_s18 }
   0xc   :  { %p117_p6 = por %p116_p5, %p115_p4 }
   0xe   :  { %p118_p7 = pnand %p117_p6, %p111_p3 }
  0x10   :  { %121 = shalt.err (!%p118_p7)
}
  0x11   :  { %s161_s19 = smov 128   ;;  %s162_s20 = smov 8  }
  0x12   :  { %21 = dma.hbm_to_vmem [thread:$0]  %s216_s0, 256, %s16_s10, [#allocation4], %s161_s19, %s161_s19, %s162_s20  }
  0x13   :  { %s163_s23 = smov [#allocation6]   ;;  %s122_s27 = scalar_lea.hbm %s217_s1, 256 }
  0x14   :  { %s27_s24 = sshll.u32 %s163_s23, 4  ;;  %p123_p8 = scmp.ne.s32.totalorder %s217_s1, %s122_s27  ;;  %s28_s24 = int_to_ptr.vmem [resolvable:$true] %s27_s24 }
  0x15   :  { %p126_p9 = scmp.lt.u32.totalorder %s122_s27, %s217_s1 }
  0x17   :  { %p128_p10 = pnand %p126_p9, %p123_p8 }
  0x19   :  { %131 = shalt.err (!%p128_p10)
}
  0x1a   :  { %s132_s4 = scalar_lea.vmem %s28_s24, 256  ;;  %p137_p12 = scmp.lt.s32.totalorder %s28_s24, %s28_s24 }
  0x1b   :  { %p133_p11 = scmp.ne.s32.totalorder %s28_s24, %s132_s4  ;;  %p138_p13 = scmp.lt.s32.totalorder %s132_s4, %s132_s4 }
  0x1d   :  { %p139_p0 = por %p138_p13, %p137_p12 }
  0x1f   :  { %p140_p1 = pnand %p139_p0, %p133_p11 }
  0x21   :  { %143 = shalt.err (!%p140_p1)
}
  0x22   :  { %33 = dma.hbm_to_vmem [thread:$0]  %s217_s1, 256, %s28_s24, [#allocation7], %s161_s19, %s161_s19, %s162_s20  }
  0x23   :  { %154 = dma.done.wait [#allocation4], 256  }
  0x24   :  { %155 = vsyncadd [#allocation4], 4294967040 }
  0x25   :  { %156 = dma.done.wait [#allocation7], 256  }
  0x26   :  { %157 = vsyncadd [#allocation7], 4294967040  ;;  %v46_v0 = vld [vmem:[#allocation3] sm:$0xff]  ;;  %v47_v1 = vld [vmem:[#allocation3 + $0x8] sm:$0xff]  ;;  %s144_s9 = scalar_lea.hbm %s218_s2, 16 }
  0x27   :  { %v48_v2 = vld [vmem:[#allocation6] sm:$0xff]  ;;  %v49_v3 = vld [vmem:[#allocation6 + $0x8] sm:$0xff]  ;;  %p145_p2 = scmp.ne.s32.totalorder %s218_s2, %s144_s9  ;;  %p148_p3 = scmp.lt.u32.totalorder %s144_s9, %s218_s2 }
  0x28   :  { %v50_v4 = vsub.f32 %v46_v0, %v48_v2  ;;  %v51_v5 = vsub.f32 %v47_v1, %v49_v3 }
  0x29   :  { %p150_p4 = pnand %p148_p3, %p145_p2 }
  0x2a   :  { %v54_v6 = vmul.f32 %v50_v4, %v50_v4  ;;  %v55_v7 = vmul.f32 %v51_v5, %v51_v5 }
  0x2c   :  { %v65_v8 = vadd.f32 %v55_v7, %v54_v6 }
  0x2e   :  { %66 = vadd.xlane.f32.xlu0 %v65_v8 }
  0xbb   :  { %v67_v9 = vpop.xlane.xlu0 %66 }
  0xbc   :  { %v68_v10 = vrot.slane %v67_v9, 4 }
  0xbe   :  { %v69_v11 = vadd.f32 %v68_v10, %v67_v9 }
  0xc0   :  { %v70_v12 = vrot.slane %v69_v11, 2 }
  0xc2   :  { %v71_v13 = vadd.f32 %v70_v12, %v69_v11 }
  0xc4   :  { %v72_v14 = vrot.slane %v71_v13, 1 }
  0xc6   :  { %v73_v15 = vadd.f32 %v72_v14, %v71_v13 }
  0xc8   :  { %93 = vpush %v73_v15 }
  0xf9   :  { %s94_s1 = spop %93 }
  0xfa   :  { %s75_s6 = smul.f32 0.00048828125, %s94_s1 }
  0xfc   :  { %77 = sst [smem:[#allocation8]] %s75_s6 }
  0xfd   :  { %153 = shalt.err (!%p150_p4)
}
  0xfe   :  { %s164_s14 = smov [#allocation8]  }
  0xff   :  { %85 = dma.smem_to_hbm %s164_s14, 16, %s218_s2, [#allocation5]  }
 0x100   :  { %158 = dma.done.wait [#allocation5], 16  }
 0x101   :  { %159 = vsyncadd [#allocation5], 4294967280 }
 0x102   :  { %89 = sfence }
 0x103   :  { %90 = vsyncpa [#allocation4], 1 }
 0x104   :  { %91 = vsyncpa [#allocation7], 1 }
 0x105   :  { %92 = vsyncpa [#allocation5], 1 }

</bundles_post_ra>
